<compile_context>
chip_gen: v7x
topology: tpu7x:2x2x1
jax: 0.10.0
libtpu: 0.0.40
codegen_flags: <defaults>
</compile_context>

<pallas_src>
import functools

import jax
import jax.numpy as jnp
from jax.experimental import pallas as pl
from jax.experimental.pallas import tpu as pltpu


# ----------------------------------------------------------------------------
# Fused Pallas kernel: conv1 GEMM -> conv2 -> conv3 -> dueling head
# ----------------------------------------------------------------------------
def _fused_forward_kernel(p_ref, w1_ref, b1_ref, w2_ref, b2_ref, w3_ref,
                          b3_ref, wh1_ref, bh1_ref, wh2_ref, bh2_ref, o_ref,
                          *, inv_a, n_pos):
    f32 = jnp.float32
    bf16 = jnp.bfloat16

    # --- conv1 as im2col GEMM: (n_pos, K1) @ (K1, 32) ------------------------
    a1 = jnp.dot(p_ref[0], w1_ref[...], preferred_element_type=f32)
    a1 = jnp.maximum(a1 + b1_ref[...], 0.0).astype(bf16)          # (n_pos, 32)

    # --- conv2 (1x1 output) as a sum of per-position GEMMs -------------------
    # Avoids an in-kernel (n_pos, 32) -> (1, n_pos*32) reshape/relayout: the
    # packed conv2 weight is (n_pos, 32, 64) and we accumulate one tiny matmul
    # per conv1 output position (n_pos = 9, fully unrolled).
    acc2 = b2_ref[...]                                            # (1, 64) f32
    for r in range(n_pos):
        acc2 = acc2 + jnp.dot(a1[r:r + 1, :], w2_ref[r],
                              preferred_element_type=f32)
    a2 = jnp.maximum(acc2, 0.0).astype(bf16)                      # (1, 64)

    # --- conv3 (1x1 output, centre tap only) ---------------------------------
    a3 = jnp.dot(a2, w3_ref[...], preferred_element_type=f32)
    a3 = jnp.maximum(a3 + b3_ref[...], 0.0).astype(bf16)          # (1, 64)

    # --- head layer 1: [value1 | adv1] merged --------------------------------
    h = jnp.dot(a3, wh1_ref[...], preferred_element_type=f32)
    h = jnp.maximum(h + bh1_ref[...], 0.0).astype(bf16)           # (1, 1024)

    # --- head layer 2: adv in lanes [0, A), value2 in lane 127, rest == 0 ----
    va = jnp.dot(h, wh2_ref[...], preferred_element_type=f32)
    va = jnp.maximum(va + bh2_ref[...], 0.0)                      # (1, 128) f32
    lane = jax.lax.broadcasted_iota(jnp.int32, va.shape, 1)
    value = jnp.sum(jnp.where(lane == 127, va, 0.0), axis=1, keepdims=True)
    # Padded lanes are exactly relu(0 + 0) = 0; the value lane is subtracted
    # explicitly, so the advantage mean only sees the A real advantage lanes.
    adv_sum = jnp.sum(va, axis=1, keepdims=True) - value
    # Dueling combine; lanes >= A hold junk and are sliced away by the caller.
    o_ref[0] = value + va - adv_sum * inv_a                       # (1, 128)


# ----------------------------------------------------------------------------
# Parameter init (deterministic, xavier-uniform weights, zero biases).
# Linear weights are stored as (in, out), i.e. transposed vs. torch.nn.Linear.
# ----------------------------------------------------------------------------
def _xavier(key, shape, fan_in, fan_out):
    bound = (6.0 / (fan_in + fan_out)) ** 0.5
    return jax.random.uniform(key, shape, jnp.float32, -bound, bound)


def init_params(key, num_obs, num_actions, hidden_dim):
    ks = jax.random.split(key, 7)
    p = {}
    # conv1: Conv2d(num_obs, 32, kernel_size=(10,14), stride=8, padding=1)
    p["conv1_w"] = _xavier(ks[0], (32, num_obs, 10, 14),
                           num_obs * 10 * 14, 32 * 10 * 14)
    p["conv1_b"] = jnp.zeros((32,), jnp.float32)
    # conv2: Conv2d(32, 64, kernel_size=4, stride=2, padding=1)
    p["conv2_w"] = _xavier(ks[1], (64, 32, 4, 4), 32 * 16, 64 * 16)
    p["conv2_b"] = jnp.zeros((64,), jnp.float32)
    # conv3: Conv2d(64, 64, kernel_size=3, stride=1, padding=1)
    p["conv3_w"] = _xavier(ks[2], (64, 64, 3, 3), 64 * 9, 64 * 9)
    p["conv3_b"] = jnp.zeros((64,), jnp.float32)
    # value head
    p["value1_w"] = _xavier(ks[3], (hidden_dim, 512), hidden_dim, 512)
    p["value1_b"] = jnp.zeros((512,), jnp.float32)
    p["value2_w"] = _xavier(ks[4], (512, 1), 512, 1)
    p["value2_b"] = jnp.zeros((1,), jnp.float32)
    # advantage head
    p["adv1_w"] = _xavier(ks[5], (hidden_dim, 512), hidden_dim, 512)
    p["adv1_b"] = jnp.zeros((512,), jnp.float32)
    p["adv2_w"] = _xavier(ks[6], (512, num_actions), 512, num_actions)
    p["adv2_b"] = jnp.zeros((num_actions,), jnp.float32)
    return p


# ----------------------------------------------------------------------------
# One-time weight packing into the fused-kernel layout (bf16, no dead padding)
# ----------------------------------------------------------------------------
def _conv_1x1_gemm_weight(w, in_h, in_w, pad):
    """Reduce a conv whose output is 1x1 to a GEMM weight.

    Returns wg of shape (in_h*in_w, C, O) such that
        out[co] = sum_{ih,iw,ci} x_nhwc[ih, iw, ci] * wg[ih*in_w + iw, ci, co],
    i.e. the conv's zero-padding taps are dropped at pack time.
    """
    O, C, KH, KW = w.shape
    h_cov = min(in_h, KH - pad)
    w_cov = min(in_w, KW - pad)
    sub = w[:, :, pad:pad + h_cov, pad:pad + w_cov]          # (O, C, hc, wc)
    sub = jnp.transpose(sub, (2, 3, 1, 0))                   # (hc, wc, C, O)
    wg = jnp.zeros((in_h, in_w, C, O), jnp.float32).at[:h_cov, :w_cov].set(sub)
    return wg.reshape(in_h * in_w, C, O)


def pack_params(p, num_actions, conv1_out_hw):
    """Reshape / merge / cast all params ONCE into the fused-kernel layout."""
    OH1, OW1 = conv1_out_hw
    A = num_actions
    assert A < 128, "value lane (127) must not collide with advantage lanes"
    # conv2 must reduce to a 1x1 output for the pack below to be valid.
    assert (OH1 + 2 - 4) // 2 + 1 == 1 and (OW1 + 2 - 4) // 2 + 1 == 1

    packed = {}
    # conv1 filters -> im2col GEMM weight.  conv_general_dilated_patches emits
    # patch features in (C, KH, KW) channel-major order, which is exactly
    # w.reshape(O, C*KH*KW).
    w1 = p["conv1_w"]
    packed["conv1_w"] = w1.reshape(w1.shape[0], -1).T.astype(jnp.bfloat16)
    packed["conv1_b"] = p["conv1_b"][None, :]                     # (1, 32) f32
    # conv2 / conv3 (1x1 outputs) -> GEMM weights on the unpadded activation.
    packed["conv2_w"] = _conv_1x1_gemm_weight(
        p["conv2_w"], OH1, OW1, pad=1).astype(jnp.bfloat16)       # (9, 32, 64)
    packed["conv2_b"] = p["conv2_b"][None, :]                     # (1, 64)
    packed["conv3_w"] = _conv_1x1_gemm_weight(
        p["conv3_w"], 1, 1, pad=1)[0].astype(jnp.bfloat16)        # (64, 64)
    packed["conv3_b"] = p["conv3_b"][None, :]                     # (1, 64)
    # Head layer 1: [value1 | adv1] merged; hidden=64 kept unpadded.
    packed["head_w1"] = jnp.concatenate(
        [p["value1_w"], p["adv1_w"]], axis=1).astype(jnp.bfloat16)  # (64, 1024)
    packed["head_b1"] = jnp.concatenate(
        [p["value1_b"], p["adv1_b"]])[None, :]                      # (1, 1024)
    # Head layer 2 packed into a single 128-lane group:
    #   rows   0:512  (value branch) -> lane 127        <- value2
    #   rows 512:1024 (adv branch)   -> lanes [0, A)    <- adv2
    # All other entries (weights AND bias) are exactly zero, so after the
    # final ReLU the unused lanes are exactly 0.
    wh2 = jnp.zeros((1024, 128), jnp.float32)
    wh2 = wh2.at[512:, :A].set(p["adv2_w"])
    wh2 = wh2.at[:512, 127].set(p["value2_w"][:, 0])
    bh2 = jnp.zeros((1, 128), jnp.float32)
    bh2 = bh2.at[0, :A].set(p["adv2_b"])
    bh2 = bh2.at[0, 127].set(p["value2_b"][0])
    packed["head_w2"] = wh2.astype(jnp.bfloat16)
    packed["head_b2"] = bh2                                        # (1, 128) f32
    return packed


# ----------------------------------------------------------------------------
# Forward pass (Network.forward): returns readout[0]
# ----------------------------------------------------------------------------
_CONV1 = dict(kh=10, kw=14, stride=8, pad=1)
_WEIGHT_NAMES = ("conv1_w", "conv1_b", "conv2_w", "conv2_b", "conv3_w",
                 "conv3_b", "head_w1", "head_b1", "head_w2", "head_b2")


def network_forward(packed, obs, *, num_actions):
    """obs: NCHW f32.  Returns readout[0] (Q-values of the first batch elem)."""
    B = obs.shape[0]
    x = jnp.transpose(obs, (0, 2, 3, 1)).astype(jnp.bfloat16)   # NCHW -> NHWC
    # TODO(synk): conv1's im2col stays as one XLA op; folding it into the
    # kernel would need manual strided DMA gathers and isn't worth it here.
    patches = jax.lax.conv_general_dilated_patches(
        x, filter_shape=(_CONV1["kh"], _CONV1["kw"]),
        window_strides=(_CONV1["stride"], _CONV1["stride"]),
        padding=((_CONV1["pad"], _CONV1["pad"]), (_CONV1["pad"], _CONV1["pad"])),
        dimension_numbers=("NHWC", "HWIO", "NHWC"))
    _, OH, OW, K1 = patches.shape
    n_pos = OH * OW
    patches = patches.reshape(B, n_pos, K1)

    def full_spec(arr):
        nd = arr.ndim
        return pl.BlockSpec(arr.shape, lambda *args, _nd=nd: (0,) * _nd)

    weights = [packed[n] for n in _WEIGHT_NAMES]
    out = pl.pallas_call(
        functools.partial(_fused_forward_kernel,
                          inv_a=1.0 / num_actions, n_pos=n_pos),
        out_shape=jax.ShapeDtypeStruct((B, 1, 128), jnp.float32),
        grid=(B,),
        in_specs=[pl.BlockSpec((1, n_pos, K1), lambda b: (b, 0, 0))]
                 + [full_spec(w) for w in weights],
        out_specs=pl.BlockSpec((1, 1, 128), lambda b: (b, 0, 0)),
        compiler_params=pltpu.CompilerParams(
            dimension_semantics=("parallel",)),
    )(patches, *weights)
    readout = out[:, 0, :num_actions]          # (B, A)
    return readout[0]


# ----------------------------------------------------------------------------
# Pure-JAX f32 reference (for a loose numerical cross-check of the packing)
# ----------------------------------------------------------------------------
def _reference_forward(params, obs):
    def conv(x, w, b, stride, pad):
        y = jax.lax.conv_general_dilated(
            x, w, (stride, stride), ((pad, pad), (pad, pad)),
            dimension_numbers=("NCHW", "OIHW", "NCHW"))
        return y + b[None, :, None, None]

    x = jax.nn.relu(conv(obs, params["conv1_w"], params["conv1_b"], 8, 1))
    x = jax.nn.relu(conv(x, params["conv2_w"], params["conv2_b"], 2, 1))
    x = jax.nn.relu(conv(x, params["conv3_w"], params["conv3_b"], 1, 1))
    o1 = x.reshape(x.shape[0], -1)                         # (B, 64), 1x1 spatial
    v = jax.nn.relu(o1 @ params["value1_w"] + params["value1_b"])
    value = jax.nn.relu(v @ params["value2_w"] + params["value2_b"])
    a = jax.nn.relu(o1 @ params["adv1_w"] + params["adv1_b"])
    adv = jax.nn.relu(a @ params["adv2_w"] + params["adv2_b"])
    q = value + adv - jnp.mean(adv, axis=1, keepdims=True)
    return q[0]


if __name__ == "__main__":
    key = jax.random.PRNGKey(0)
    k_obs, k_params = jax.random.split(key)

    B, num_obs, H, W = 2, 4, 30, 30          # small NCHW input
    num_actions = 6
    # conv1: (30+2-10)//8+1 = 3 ; (30+2-14)//8+1 = 3  -> 3 x 3 x 32
    # conv2: (3+2-4)//2+1   = 1                       -> 1 x 1 x 64
    # conv3: (1+2-3)//1+1   = 1                       -> 1 x 1 x 64
    OH1 = (H + 2 * _CONV1["pad"] - _CONV1["kh"]) // _CONV1["stride"] + 1
    OW1 = (W + 2 * _CONV1["pad"] - _CONV1["kw"]) // _CONV1["stride"] + 1
    hidden_dim = 64

    obs = jax.random.normal(k_obs, (B, num_obs, H, W), jnp.float32)
    # `action` argument of the reference forward is unused.
    params = init_params(k_params, num_obs, num_actions, hidden_dim)
    packed = pack_params(params, num_actions, (OH1, OW1))   # one-time prep

    fwd = jax.jit(functools.partial(network_forward, num_actions=num_actions))
    out = fwd(packed, obs)
    jax.block_until_ready(out)
    assert out.shape == (num_actions,)

    # Loose cross-check against the f32 reference (kernel runs in bf16).
    ref = _reference_forward(params, obs)
    err = float(jnp.max(jnp.abs(out - ref)))
    assert err < 2e-2, f"max abs err {err}"

    print("KERNEL_OK")
</pallas_src>

<mosaic_0001>
module attributes {stable_mosaic.version = 11 : i64} {
  func.func @_fused_forward_kernel(%arg0: i32, %arg1: memref<1x9x560xbf16, #tpu.memory_space<vmem>>, %arg2: memref<560x32xbf16, #tpu.memory_space<vmem>>, %arg3: memref<1x32xf32, #tpu.memory_space<vmem>>, %arg4: memref<9x32x64xbf16, #tpu.memory_space<vmem>>, %arg5: memref<1x64xf32, #tpu.memory_space<vmem>>, %arg6: memref<64x64xbf16, #tpu.memory_space<vmem>>, %arg7: memref<1x64xf32, #tpu.memory_space<vmem>>, %arg8: memref<64x1024xbf16, #tpu.memory_space<vmem>>, %arg9: memref<1x1024xf32, #tpu.memory_space<vmem>>, %arg10: memref<1024x128xbf16, #tpu.memory_space<vmem>>, %arg11: memref<1x128xf32, #tpu.memory_space<vmem>>, %arg12: memref<1x1x128xf32, #tpu.memory_space<vmem>>) attributes {dimension_semantics = [#tpu.dimension_semantics<parallel>], iteration_bounds = array<i64: 2>, scalar_prefetch = 0 : i64, scratch_operands = 0 : i64, tpu.core_type = #tpu.core_type<tc>, window_params = [{transform_indices = @transform_0, window_bounds = array<i64: 1, 9, 560>}, {pipeline_mode = #tpu.pipeline_mode<synchronous>, transform_indices = @transform_1, window_bounds = array<i64: 560, 32>}, {pipeline_mode = #tpu.pipeline_mode<synchronous>, transform_indices = @transform_2, window_bounds = array<i64: 1, 32>}, {pipeline_mode = #tpu.pipeline_mode<synchronous>, transform_indices = @transform_3, window_bounds = array<i64: 9, 32, 64>}, {pipeline_mode = #tpu.pipeline_mode<synchronous>, transform_indices = @transform_4, window_bounds = array<i64: 1, 64>}, {pipeline_mode = #tpu.pipeline_mode<synchronous>, transform_indices = @transform_5, window_bounds = array<i64: 64, 64>}, {pipeline_mode = #tpu.pipeline_mode<synchronous>, transform_indices = @transform_6, window_bounds = array<i64: 1, 64>}, {pipeline_mode = #tpu.pipeline_mode<synchronous>, transform_indices = @transform_7, window_bounds = array<i64: 64, 1024>}, {pipeline_mode = #tpu.pipeline_mode<synchronous>, transform_indices = @transform_8, window_bounds = array<i64: 1, 1024>}, {pipeline_mode = #tpu.pipeline_mode<synchronous>, transform_indices = @transform_9, window_bounds = array<i64: 1024, 128>}, {pipeline_mode = #tpu.pipeline_mode<synchronous>, transform_indices = @transform_10, window_bounds = array<i64: 1, 128>}, {transform_indices = @transform_11, window_bounds = array<i64: 1, 1, 128>}]} {
    %c0 = arith.constant 0 : index
    %c0_0 = arith.constant 0 : index
    %c0_1 = arith.constant 0 : index
    %0 = vector.load %arg1[%c0, %c0_0, %c0_1] : memref<1x9x560xbf16, #tpu.memory_space<vmem>>, vector<1x9x560xbf16>
    %1 = vector.shape_cast %0 : vector<1x9x560xbf16> to vector<9x560xbf16>
    %c0_2 = arith.constant 0 : index
    %c0_3 = arith.constant 0 : index
    %2 = vector.load %arg2[%c0_2, %c0_3] : memref<560x32xbf16, #tpu.memory_space<vmem>>, vector<560x32xbf16>
    %cst = arith.constant dense<0.000000e+00> : vector<9x32xf32>
    %3 = tpu.matmul %1, %2, %cst {dimension_numbers = #tpu.dot_dimension_numbers<[1], [0], [0], [1], [0, 0, 1, 1], [], []>} : vector<9x560xbf16>, vector<560x32xbf16>, vector<9x32xf32> -> vector<9x32xf32>
    %c0_4 = arith.constant 0 : index
    %c0_5 = arith.constant 0 : index
    %4 = vector.load %arg3[%c0_4, %c0_5] : memref<1x32xf32, #tpu.memory_space<vmem>>, vector<1x32xf32>
    %5 = vector.broadcast %4 : vector<1x32xf32> to vector<9x32xf32>
    %6 = arith.addf %3, %5 : vector<9x32xf32>
    %cst_6 = arith.constant 0.000000e+00 : f32
    %7 = vector.broadcast %cst_6 : f32 to vector<9x32xf32>
    %8 = arith.maximumf %6, %7 : vector<9x32xf32>
    %9 = arith.truncf %8 : vector<9x32xf32> to vector<9x32xbf16>
    %c0_7 = arith.constant 0 : index
    %c0_8 = arith.constant 0 : index
    %10 = vector.load %arg5[%c0_7, %c0_8] : memref<1x64xf32, #tpu.memory_space<vmem>>, vector<1x64xf32>
    %11 = vector.extract_strided_slice %9 {offsets = [0, 0], sizes = [1, 32], strides = [1, 1]} : vector<9x32xbf16> to vector<1x32xbf16>
    %c0_9 = arith.constant 0 : index
    %c0_10 = arith.constant 0 : index
    %c0_11 = arith.constant 0 : index
    %12 = vector.load %arg4[%c0_9, %c0_10, %c0_11] : memref<9x32x64xbf16, #tpu.memory_space<vmem>>, vector<1x32x64xbf16>
    %13 = vector.shape_cast %12 : vector<1x32x64xbf16> to vector<32x64xbf16>
    %cst_12 = arith.constant dense<0.000000e+00> : vector<1x64xf32>
    %14 = tpu.matmul %11, %13, %cst_12 {dimension_numbers = #tpu.dot_dimension_numbers<[1], [0], [0], [1], [0, 0, 1, 1], [], []>} : vector<1x32xbf16>, vector<32x64xbf16>, vector<1x64xf32> -> vector<1x64xf32>
    %15 = arith.addf %10, %14 : vector<1x64xf32>
    %16 = vector.extract_strided_slice %9 {offsets = [1, 0], sizes = [1, 32], strides = [1, 1]} : vector<9x32xbf16> to vector<1x32xbf16>
    %c1 = arith.constant 1 : index
    %c0_13 = arith.constant 0 : index
    %c0_14 = arith.constant 0 : index
    %17 = vector.load %arg4[%c1, %c0_13, %c0_14] : memref<9x32x64xbf16, #tpu.memory_space<vmem>>, vector<1x32x64xbf16>
    %18 = vector.shape_cast %17 : vector<1x32x64xbf16> to vector<32x64xbf16>
    %cst_15 = arith.constant dense<0.000000e+00> : vector<1x64xf32>
    %19 = tpu.matmul %16, %18, %cst_15 {dimension_numbers = #tpu.dot_dimension_numbers<[1], [0], [0], [1], [0, 0, 1, 1], [], []>} : vector<1x32xbf16>, vector<32x64xbf16>, vector<1x64xf32> -> vector<1x64xf32>
    %20 = arith.addf %15, %19 : vector<1x64xf32>
    %21 = vector.extract_strided_slice %9 {offsets = [2, 0], sizes = [1, 32], strides = [1, 1]} : vector<9x32xbf16> to vector<1x32xbf16>
    %c2 = arith.constant 2 : index
    %c0_16 = arith.constant 0 : index
    %c0_17 = arith.constant 0 : index
    %22 = vector.load %arg4[%c2, %c0_16, %c0_17] : memref<9x32x64xbf16, #tpu.memory_space<vmem>>, vector<1x32x64xbf16>
    %23 = vector.shape_cast %22 : vector<1x32x64xbf16> to vector<32x64xbf16>
    %cst_18 = arith.constant dense<0.000000e+00> : vector<1x64xf32>
    %24 = tpu.matmul %21, %23, %cst_18 {dimension_numbers = #tpu.dot_dimension_numbers<[1], [0], [0], [1], [0, 0, 1, 1], [], []>} : vector<1x32xbf16>, vector<32x64xbf16>, vector<1x64xf32> -> vector<1x64xf32>
    %25 = arith.addf %20, %24 : vector<1x64xf32>
    %26 = vector.extract_strided_slice %9 {offsets = [3, 0], sizes = [1, 32], strides = [1, 1]} : vector<9x32xbf16> to vector<1x32xbf16>
    %c3 = arith.constant 3 : index
    %c0_19 = arith.constant 0 : index
    %c0_20 = arith.constant 0 : index
    %27 = vector.load %arg4[%c3, %c0_19, %c0_20] : memref<9x32x64xbf16, #tpu.memory_space<vmem>>, vector<1x32x64xbf16>
    %28 = vector.shape_cast %27 : vector<1x32x64xbf16> to vector<32x64xbf16>
    %cst_21 = arith.constant dense<0.000000e+00> : vector<1x64xf32>
    %29 = tpu.matmul %26, %28, %cst_21 {dimension_numbers = #tpu.dot_dimension_numbers<[1], [0], [0], [1], [0, 0, 1, 1], [], []>} : vector<1x32xbf16>, vector<32x64xbf16>, vector<1x64xf32> -> vector<1x64xf32>
    %30 = arith.addf %25, %29 : vector<1x64xf32>
    %31 = vector.extract_strided_slice %9 {offsets = [4, 0], sizes = [1, 32], strides = [1, 1]} : vector<9x32xbf16> to vector<1x32xbf16>
    %c4 = arith.constant 4 : index
    %c0_22 = arith.constant 0 : index
    %c0_23 = arith.constant 0 : index
    %32 = vector.load %arg4[%c4, %c0_22, %c0_23] : memref<9x32x64xbf16, #tpu.memory_space<vmem>>, vector<1x32x64xbf16>
    %33 = vector.shape_cast %32 : vector<1x32x64xbf16> to vector<32x64xbf16>
    %cst_24 = arith.constant dense<0.000000e+00> : vector<1x64xf32>
    %34 = tpu.matmul %31, %33, %cst_24 {dimension_numbers = #tpu.dot_dimension_numbers<[1], [0], [0], [1], [0, 0, 1, 1], [], []>} : vector<1x32xbf16>, vector<32x64xbf16>, vector<1x64xf32> -> vector<1x64xf32>
    %35 = arith.addf %30, %34 : vector<1x64xf32>
    %36 = vector.extract_strided_slice %9 {offsets = [5, 0], sizes = [1, 32], strides = [1, 1]} : vector<9x32xbf16> to vector<1x32xbf16>
    %c5 = arith.constant 5 : index
    %c0_25 = arith.constant 0 : index
    %c0_26 = arith.constant 0 : index
    %37 = vector.load %arg4[%c5, %c0_25, %c0_26] : memref<9x32x64xbf16, #tpu.memory_space<vmem>>, vector<1x32x64xbf16>
    %38 = vector.shape_cast %37 : vector<1x32x64xbf16> to vector<32x64xbf16>
    %cst_27 = arith.constant dense<0.000000e+00> : vector<1x64xf32>
    %39 = tpu.matmul %36, %38, %cst_27 {dimension_numbers = #tpu.dot_dimension_numbers<[1], [0], [0], [1], [0, 0, 1, 1], [], []>} : vector<1x32xbf16>, vector<32x64xbf16>, vector<1x64xf32> -> vector<1x64xf32>
    %40 = arith.addf %35, %39 : vector<1x64xf32>
    %41 = vector.extract_strided_slice %9 {offsets = [6, 0], sizes = [1, 32], strides = [1, 1]} : vector<9x32xbf16> to vector<1x32xbf16>
    %c6 = arith.constant 6 : index
    %c0_28 = arith.constant 0 : index
    %c0_29 = arith.constant 0 : index
    %42 = vector.load %arg4[%c6, %c0_28, %c0_29] : memref<9x32x64xbf16, #tpu.memory_space<vmem>>, vector<1x32x64xbf16>
    %43 = vector.shape_cast %42 : vector<1x32x64xbf16> to vector<32x64xbf16>
    %cst_30 = arith.constant dense<0.000000e+00> : vector<1x64xf32>
    %44 = tpu.matmul %41, %43, %cst_30 {dimension_numbers = #tpu.dot_dimension_numbers<[1], [0], [0], [1], [0, 0, 1, 1], [], []>} : vector<1x32xbf16>, vector<32x64xbf16>, vector<1x64xf32> -> vector<1x64xf32>
    %45 = arith.addf %40, %44 : vector<1x64xf32>
    %46 = vector.extract_strided_slice %9 {offsets = [7, 0], sizes = [1, 32], strides = [1, 1]} : vector<9x32xbf16> to vector<1x32xbf16>
    %c7 = arith.constant 7 : index
    %c0_31 = arith.constant 0 : index
    %c0_32 = arith.constant 0 : index
    %47 = vector.load %arg4[%c7, %c0_31, %c0_32] : memref<9x32x64xbf16, #tpu.memory_space<vmem>>, vector<1x32x64xbf16>
    %48 = vector.shape_cast %47 : vector<1x32x64xbf16> to vector<32x64xbf16>
    %cst_33 = arith.constant dense<0.000000e+00> : vector<1x64xf32>
    %49 = tpu.matmul %46, %48, %cst_33 {dimension_numbers = #tpu.dot_dimension_numbers<[1], [0], [0], [1], [0, 0, 1, 1], [], []>} : vector<1x32xbf16>, vector<32x64xbf16>, vector<1x64xf32> -> vector<1x64xf32>
    %50 = arith.addf %45, %49 : vector<1x64xf32>
    %51 = vector.extract_strided_slice %9 {offsets = [8, 0], sizes = [1, 32], strides = [1, 1]} : vector<9x32xbf16> to vector<1x32xbf16>
    %c8 = arith.constant 8 : index
    %c0_34 = arith.constant 0 : index
    %c0_35 = arith.constant 0 : index
    %52 = vector.load %arg4[%c8, %c0_34, %c0_35] : memref<9x32x64xbf16, #tpu.memory_space<vmem>>, vector<1x32x64xbf16>
    %53 = vector.shape_cast %52 : vector<1x32x64xbf16> to vector<32x64xbf16>
    %cst_36 = arith.constant dense<0.000000e+00> : vector<1x64xf32>
    %54 = tpu.matmul %51, %53, %cst_36 {dimension_numbers = #tpu.dot_dimension_numbers<[1], [0], [0], [1], [0, 0, 1, 1], [], []>} : vector<1x32xbf16>, vector<32x64xbf16>, vector<1x64xf32> -> vector<1x64xf32>
    %55 = arith.addf %50, %54 : vector<1x64xf32>
    %cst_37 = arith.constant 0.000000e+00 : f32
    %56 = vector.broadcast %cst_37 : f32 to vector<1x64xf32>
    %57 = arith.maximumf %55, %56 : vector<1x64xf32>
    %58 = arith.truncf %57 : vector<1x64xf32> to vector<1x64xbf16>
    %c0_38 = arith.constant 0 : index
    %c0_39 = arith.constant 0 : index
    %59 = vector.load %arg6[%c0_38, %c0_39] : memref<64x64xbf16, #tpu.memory_space<vmem>>, vector<64x64xbf16>
    %cst_40 = arith.constant dense<0.000000e+00> : vector<1x64xf32>
    %60 = tpu.matmul %58, %59, %cst_40 {dimension_numbers = #tpu.dot_dimension_numbers<[1], [0], [0], [1], [0, 0, 1, 1], [], []>} : vector<1x64xbf16>, vector<64x64xbf16>, vector<1x64xf32> -> vector<1x64xf32>
    %c0_41 = arith.constant 0 : index
    %c0_42 = arith.constant 0 : index
    %61 = vector.load %arg7[%c0_41, %c0_42] : memref<1x64xf32, #tpu.memory_space<vmem>>, vector<1x64xf32>
    %62 = arith.addf %60, %61 : vector<1x64xf32>
    %cst_43 = arith.constant 0.000000e+00 : f32
    %63 = vector.broadcast %cst_43 : f32 to vector<1x64xf32>
    %64 = arith.maximumf %62, %63 : vector<1x64xf32>
    %65 = arith.truncf %64 : vector<1x64xf32> to vector<1x64xbf16>
    %c0_44 = arith.constant 0 : index
    %c0_45 = arith.constant 0 : index
    %66 = vector.load %arg8[%c0_44, %c0_45] : memref<64x1024xbf16, #tpu.memory_space<vmem>>, vector<64x1024xbf16>
    %cst_46 = arith.constant dense<0.000000e+00> : vector<1x1024xf32>
    %67 = tpu.matmul %65, %66, %cst_46 {dimension_numbers = #tpu.dot_dimension_numbers<[1], [0], [0], [1], [0, 0, 1, 1], [], []>} : vector<1x64xbf16>, vector<64x1024xbf16>, vector<1x1024xf32> -> vector<1x1024xf32>
    %c0_47 = arith.constant 0 : index
    %c0_48 = arith.constant 0 : index
    %68 = vector.load %arg9[%c0_47, %c0_48] : memref<1x1024xf32, #tpu.memory_space<vmem>>, vector<1x1024xf32>
    %69 = arith.addf %67, %68 : vector<1x1024xf32>
    %cst_49 = arith.constant 0.000000e+00 : f32
    %70 = vector.broadcast %cst_49 : f32 to vector<1x1024xf32>
    %71 = arith.maximumf %69, %70 : vector<1x1024xf32>
    %72 = arith.truncf %71 : vector<1x1024xf32> to vector<1x1024xbf16>
    %c0_50 = arith.constant 0 : index
    %c0_51 = arith.constant 0 : index
    %73 = vector.load %arg10[%c0_50, %c0_51] : memref<1024x128xbf16, #tpu.memory_space<vmem>>, vector<1024x128xbf16>
    %cst_52 = arith.constant dense<0.000000e+00> : vector<1x128xf32>
    %74 = tpu.matmul %72, %73, %cst_52 {dimension_numbers = #tpu.dot_dimension_numbers<[1], [0], [0], [1], [0, 0, 1, 1], [], []>} : vector<1x1024xbf16>, vector<1024x128xbf16>, vector<1x128xf32> -> vector<1x128xf32>
    %c0_53 = arith.constant 0 : index
    %c0_54 = arith.constant 0 : index
    %75 = vector.load %arg11[%c0_53, %c0_54] : memref<1x128xf32, #tpu.memory_space<vmem>>, vector<1x128xf32>
    %76 = arith.addf %74, %75 : vector<1x128xf32>
    %cst_55 = arith.constant 0.000000e+00 : f32
    %77 = vector.broadcast %cst_55 : f32 to vector<1x128xf32>
    %78 = arith.maximumf %76, %77 : vector<1x128xf32>
    %79 = tpu.iota {dimensions = array<i32: 1>} : vector<1x128xi32>
    %c127_i32 = arith.constant 127 : i32
    %80 = vector.broadcast %c127_i32 : i32 to vector<1x128xi32>
    %81 = arith.cmpi eq, %79, %80 : vector<1x128xi32>
    %cst_56 = arith.constant 0.000000e+00 : f32
    %82 = vector.broadcast %cst_56 : f32 to vector<1x128xf32>
    %83 = arith.select %81, %78, %82 : vector<1x128xi1>, vector<1x128xf32>
    %cst_57 = arith.constant dense<0.000000e+00> : vector<1xf32>
    %84 = vector.multi_reduction <add>, %83, %cst_57 [1] : vector<1x128xf32> to vector<1xf32>
    %85 = vector.shape_cast %84 : vector<1xf32> to vector<1x1xf32>
    %cst_58 = arith.constant dense<0.000000e+00> : vector<1xf32>
    %86 = vector.multi_reduction <add>, %78, %cst_58 [1] : vector<1x128xf32> to vector<1xf32>
    %87 = vector.shape_cast %86 : vector<1xf32> to vector<1x1xf32>
    %88 = arith.subf %87, %85 : vector<1x1xf32>
    %89 = vector.broadcast %85 : vector<1x1xf32> to vector<1x128xf32>
    %90 = arith.addf %89, %78 : vector<1x128xf32>
    %cst_59 = arith.constant 0.166666672 : f32
    %91 = vector.broadcast %cst_59 : f32 to vector<1x1xf32>
    %92 = arith.mulf %88, %91 : vector<1x1xf32>
    %93 = vector.broadcast %92 : vector<1x1xf32> to vector<1x128xf32>
    %94 = arith.subf %90, %93 : vector<1x128xf32>
    %c0_60 = arith.constant 0 : index
    %c0_61 = arith.constant 0 : index
    %c0_62 = arith.constant 0 : index
    %95 = vector.load %arg12[%c0_60, %c0_61, %c0_62] : memref<1x1x128xf32, #tpu.memory_space<vmem>>, vector<1x1x128xf32>
    %96 = vector.shape_cast %95 : vector<1x1x128xf32> to vector<1x128xf32>
    %97 = vector.shape_cast %94 : vector<1x128xf32> to vector<1x1x128xf32>
    tpu.vector_store %arg12[%c0_60, %c0_61, %c0_62], %97 {strides = array<i32>} : memref<1x1x128xf32, #tpu.memory_space<vmem>>, vector<1x1x128xf32>,
    return
  }
  func.func @transform_0(%arg0: i32) -> (i32, i32, i32) {
    %c0_i32 = arith.constant 0 : i32
    %c0_i32_0 = arith.constant 0 : i32
    %c0_i32_1 = arith.constant 0 : i32
    return %arg0, %c0_i32, %c0_i32_0 : i32, i32, i32
  }
  func.func @transform_1(%arg0: i32) -> (i32, i32) {
    %c0_i32 = arith.constant 0 : i32
    %c0_i32_0 = arith.constant 0 : i32
    %c0_i32_1 = arith.constant 0 : i32
    return %c0_i32, %c0_i32_0 : i32, i32
  }
  func.func @transform_2(%arg0: i32) -> (i32, i32) {
    %c0_i32 = arith.constant 0 : i32
    %c0_i32_0 = arith.constant 0 : i32
    %c0_i32_1 = arith.constant 0 : i32
    return %c0_i32, %c0_i32_0 : i32, i32
  }
  func.func @transform_3(%arg0: i32) -> (i32, i32, i32) {
    %c0_i32 = arith.constant 0 : i32
    %c0_i32_0 = arith.constant 0 : i32
    %c0_i32_1 = arith.constant 0 : i32
    %c0_i32_2 = arith.constant 0 : i32
    return %c0_i32, %c0_i32_0, %c0_i32_1 : i32, i32, i32
  }
  func.func @transform_4(%arg0: i32) -> (i32, i32) {
    %c0_i32 = arith.constant 0 : i32
    %c0_i32_0 = arith.constant 0 : i32
    %c0_i32_1 = arith.constant 0 : i32
    return %c0_i32, %c0_i32_0 : i32, i32
  }
  func.func @transform_5(%arg0: i32) -> (i32, i32) {
    %c0_i32 = arith.constant 0 : i32
    %c0_i32_0 = arith.constant 0 : i32
    %c0_i32_1 = arith.constant 0 : i32
    return %c0_i32, %c0_i32_0 : i32, i32
  }
  func.func @transform_6(%arg0: i32) -> (i32, i32) {
    %c0_i32 = arith.constant 0 : i32
    %c0_i32_0 = arith.constant 0 : i32
    %c0_i32_1 = arith.constant 0 : i32
    return %c0_i32, %c0_i32_0 : i32, i32
  }
  func.func @transform_7(%arg0: i32) -> (i32, i32) {
    %c0_i32 = arith.constant 0 : i32
    %c0_i32_0 = arith.constant 0 : i32
    %c0_i32_1 = arith.constant 0 : i32
    return %c0_i32, %c0_i32_0 : i32, i32
  }
  func.func @transform_8(%arg0: i32) -> (i32, i32) {
    %c0_i32 = arith.constant 0 : i32
    %c0_i32_0 = arith.constant 0 : i32
    %c0_i32_1 = arith.constant 0 : i32
    return %c0_i32, %c0_i32_0 : i32, i32
  }
  func.func @transform_9(%arg0: i32) -> (i32, i32) {
    %c0_i32 = arith.constant 0 : i32
    %c0_i32_0 = arith.constant 0 : i32
    %c0_i32_1 = arith.constant 0 : i32
    return %c0_i32, %c0_i32_0 : i32, i32
  }
  func.func @transform_10(%arg0: i32) -> (i32, i32) {
    %c0_i32 = arith.constant 0 : i32
    %c0_i32_0 = arith.constant 0 : i32
    %c0_i32_1 = arith.constant 0 : i32
    return %c0_i32, %c0_i32_0 : i32, i32
  }
  func.func @transform_11(%arg0: i32) -> (i32, i32, i32) {
    %c0_i32 = arith.constant 0 : i32
    %c0_i32_0 = arith.constant 0 : i32
    %c0_i32_1 = arith.constant 0 : i32
    return %arg0, %c0_i32, %c0_i32_0 : i32, i32, i32
  }
}

</mosaic_0001>

<bundles_post_ra>
// kernel: network_forward.1
= control target key start
LH: loop header
LB: loop body
LE: loop exit
PB: predicated region body
PF: predicated region fallthrough
CT: control target
= control target key end

     0   :  { %s3344_s17 = smov 0   ;;  %s3944_s0 = inlined_call_operand.vmem [shape: bf16[2,9,560], index: 0, kind: input, shape index: {}]   ;;  %s3945_s1 = inlined_call_operand.vmem [shape: bf16[560,32], index: 1, kind: input, shape index: {}]   ;;  %s3946_s2 = inlined_call_operand.vmem [shape: f32[1,32], index: 2, kind: input, shape index: {}]   ;;  %s3947_s3 = inlined_call_operand.vmem [shape: bf16[9,32,64], index: 3, kind: input, shape index: {}]   ;;  %s3948_s4 = inlined_call_operand.vmem [shape: f32[1,64], index: 4, kind: input, shape index: {}]   ;;  %s3949_s5 = inlined_call_operand.vmem [shape: bf16[64,64], index: 5, kind: input, shape index: {}]   ;;  %s3950_s6 = inlined_call_operand.vmem [shape: f32[1,64], index: 6, kind: input, shape index: {}]   ;;  %s3951_s7 = inlined_call_operand.vmem [shape: bf16[64,1024], index: 7, kind: input, shape index: {}]   ;;  %s3952_s8 = inlined_call_operand.vmem [shape: f32[1,1024], index: 8, kind: input, shape index: {}]   ;;  %s3953_s9 = inlined_call_operand.vmem [shape: bf16[1024,128], index: 9, kind: input, shape index: {}]   ;;  %s3954_s10 = inlined_call_operand.vmem [shape: f32[1,128], index: 10, kind: input, shape index: {}]   ;;  %s3955_s11 = inlined_call_operand.vmem [shape: f32[2,1,128], index: 11, kind: output, shape index: {}]  }
   0x1 LB: > { %s2627_s18 = sadd.s32 4294967295, %s3279_s17   ;;  %p2631_p0 = scmp.ge.s32.totalorder %s3279_s17, 1  ;;  %s3279_s17 = sphi %s3344_s17, %s21_s17  }
   0x2   : > { %p337_p1 = scmp.lt.s32.totalorder %s3279_s17, 3 }
   0x4   : > { %p338_p2 = pnand %p2631_p0, %p337_p1 }
   0x5   : > { %v3145_v0 = vld [vmem:[%s3945_s1 + $0x40] sm:$0xff] (!%p338_p2)   ;;  %v3149_v4 = vld [vmem:[%s3945_s1 + $0x48] sm:$0xff] (!%p338_p2)   ;;  %v3153_v8 = vld [vmem:[%s3945_s1 + $0x50] sm:$0xff] (!%p338_p2)   ;;  %p375_p3 = scmp.lt.s32.totalorder (!%p338_p2), %s2627_s18, 1  ;;  %v3281_v34 = vmov (!%p338_p2), 0.0   ;;  %vm3282_vm0 = vmmov (!%p338_p2), 0  }
   0x6   : > { %341 = sbr.rel (%p338_p2) target bundleno = 1434 (0x59a), region = 64  ;;  %v3146_v1 = vld [vmem:[%s3945_s1] sm:$0xff] (!%p338_p2)   ;;  %2841 = vmatprep.subr.bf16.mxu0 (!%p338_p2), %v3145_v0  ;;  %v3150_v5 = vld [vmem:[%s3945_s1 + $0x8] sm:$0xff] (!%p338_p2)   ;;  %v3154_v9 = vld [vmem:[%s3945_s1 + $0x10] sm:$0xff] (!%p338_p2)   ;;  %vm702_vm1 = vcmask (!%p338_p2), 392192   ;;  %vm849_vm2 = vcmask (!%p338_p2), 261120  }
   0x7   : > { %v3147_v2 = vld [vmem:[%s3945_s1 + $0xc0] sm:$0xff] (!%p338_p2)   ;;  %2842 = vmatpush3.bf16.msra.mxu0 (!%p338_p2), %v3146_v1  ;;  %v3151_v6 = vld [vmem:[%s3945_s1 + $0xc8] sm:$0xff] (!%p338_p2)   ;;  %v3155_v10 = vld [vmem:[%s3945_s1 + $0xd0] sm:$0xff] (!%p338_p2)   ;;  %vm1427_vm3 = vcmask (!%p338_p2), 523264   ;;  %vm2568_vm5 = vcmask (!%p338_p2), 1040384  }
   0x8   : > { %v3148_v3 = vld [vmem:[%s3945_s1 + $0x80] sm:$0xff] (!%p338_p2)   ;;  %2863 = vmatprep.subr.bf16.mxu1 (!%p338_p2), %v3147_v2  ;;  %2843 = vmatprep.subr.bf16.mxu0 (!%p338_p2), %v3149_v4  ;;  %v3152_v7 = vld [vmem:[%s3945_s1 + $0x88] sm:$0xff] (!%p338_p2)   ;;  %v3156_v11 = vld [vmem:[%s3945_s1 + $0x90] sm:$0xff] (!%p338_p2)  }
   0x9   : > { %2864 = vmatpush3.bf16.msra.mxu1 (!%p338_p2), %v3148_v3  ;;  %v3157_v12 = vld [vmem:[%s3945_s1 + $0x58] sm:$0xff] (!%p338_p2)   ;;  %v3161_v16 = vld [vmem:[%s3945_s1 + $0x60] sm:$0xff] (!%p338_p2)   ;;  %v3165_v20 = vld [vmem:[%s3945_s1 + $0x68] sm:$0xff] (!%p338_p2)  }
   0xa   : > { %2865 = vmatprep.subr.bf16.mxu1 (!%p338_p2), %v3151_v6  ;;  %v3158_v13 = vld [vmem:[%s3945_s1 + $0x18] sm:$0xff] (!%p338_p2)   ;;  %v3162_v17 = vld [vmem:[%s3945_s1 + $0x20] sm:$0xff] (!%p338_p2)   ;;  %v3166_v21 = vld [vmem:[%s3945_s1 + $0x28] sm:$0xff] (!%p338_p2)  }
   0xb   : > { %2844 = vmatpush3.bf16.msra.mxu0 (!%p338_p2), %v3150_v5  ;;  %v3159_v14 = vld [vmem:[%s3945_s1 + $0xd8] sm:$0xff] (!%p338_p2)   ;;  %v3163_v18 = vld [vmem:[%s3945_s1 + $0xe0] sm:$0xff] (!%p338_p2)   ;;  %v3167_v22 = vld [vmem:[%s3945_s1 + $0xe8] sm:$0xff] (!%p338_p2)  }
   0xc   : > { %2845 = vmatprep.subr.bf16.mxu0 (!%p338_p2), %v3153_v8  ;;  %v3160_v15 = vld [vmem:[%s3945_s1 + $0x98] sm:$0xff] (!%p338_p2)   ;;  %v3164_v19 = vld [vmem:[%s3945_s1 + $0xa0] sm:$0xff] (!%p338_p2)   ;;  %v3168_v23 = vld [vmem:[%s3945_s1 + $0xa8] sm:$0xff] (!%p338_p2)  }
   0xd   : > { %2866 = vmatpush3.bf16.msra.mxu1 %v3152_v7  ;;  %s3957_s18 = smov (!%p375_p3, %s2627_s18), 1  ;;  %v3169_v24 = vld [vmem:[%s3945_s1 + $0x70] sm:$0xff]   ;;  %v3173_v28 = vld [vmem:[%s3945_s1 + $0x78] sm:$0xff]   ;;  %v3183_v37 = vld [vmem:[%s3945_s1 + $0x100] sm:$0xff]  }
   0xe   : > { %2867 = vmatprep.subr.bf16.mxu1 %v3155_v10  ;;  %s3133_s16 = smul.u32 40, %s3957_s18  ;;  %v3170_v25 = vld [vmem:[%s3945_s1 + $0x30] sm:$0xff]   ;;  %v3174_v29 = vld [vmem:[%s3945_s1 + $0x38] sm:$0xff]   ;;  %v3184_v38 = vld [vmem:[%s3945_s1 + $0x108] sm:$0xff]  }
   0xf   : > { %2846 = vmatpush3.bf16.msra.mxu0 %v3154_v9  ;;  %v3171_v26 = vld [vmem:[%s3945_s1 + $0xf0] sm:$0xff]   ;;  %v3175_v30 = vld [vmem:[%s3945_s1 + $0xf8] sm:$0xff]   ;;  %v3187_v41 = vld [vmem:[%s3947_s3] sm:$0xff]  }
  0x10   : > { %2847 = vmatprep.subr.bf16.mxu0 %v3157_v12  ;;  %v3172_v27 = vld [vmem:[%s3945_s1 + $0xb0] sm:$0xff]   ;;  %s3449_s29 = scalar_lea.vmem %s3944_s0, %s3133_s16  ;;  %v3179_v33 = vld [vmem:[%s3945_s1 + $0xb8] sm:$0xff]   ;;  %v3189_v43 = vld [vmem:[%s3947_s3 + $0x8] sm:$0xff]   ;;  %s382_s16 = scalar_lea.vmem %s3955_s11, %s3957_s18 }
  0x11   : > { %2868 = vmatpush3.bf16.msra.mxu1 %v3156_v11  ;;  %v3176_v31 = vld [vmem:[%s3449_s29] ss:$20 sps:$4 sm:$0x1f]   ;;  %v3178_v32 = vld [vmem:[%s3449_s29 + $0x4] ss:$20 sps:$4 sm:$0x1f]  }
  0x12   : > { %2869 = vmatprep.subr.bf16.mxu1 %v3159_v14  ;;  %738 = vmatprep.mubr.bf16.mxu0 %v3178_v32  ;;  %v3180_v35 = vld [vmem:[%s3449_s29 + $0x8] ss:$20 sps:$4 sm:$0x1f]   ;;  %v3182_v36 = vld [vmem:[%s3449_s29 + $0xc] ss:$20 sps:$4 sm:$0x1f]  }
  0x13   : > { %2848 = vmatpush3.bf16.msra.mxu0 %v3158_v13  ;;  %779 = vmatprep.mubr.bf16.mxu1 %v3182_v36  ;;  %v3185_v39 = vld [vmem:[%s3945_s1 + $0x110] sm:$0xff]   ;;  %v3190_v44 = vld [vmem:[%s3947_s3 + $0x18] sm:$0xff]   ;;  %v2633_v46 = vld [vmem:[%s3946_s2] ss:$0 sm:$0xff] }
  0x14   : > { %2849 = vmatprep.subr.bf16.mxu0 %v3161_v16  ;;  %v3186_v40 = vld [vmem:[%s3449_s29 + $0x10] ss:$20 sps:$4 sm:$0x1f]   ;;  %v3192_v9 = vld [vmem:[%s3947_s3 + $0x28] sm:$0xff]   ;;  %v3194_v12 = vld [vmem:[%s3947_s3 + $0x38] sm:$0xff]  }
  0x15   : > { %2870 = vmatpush3.bf16.msra.mxu1 %v3160_v15  ;;  %v3188_v42 = vld [vmem:[%s3947_s3 + $0x10] sm:$0xff]   ;;  %v3191_v7 = vld [vmem:[%s3947_s3 + $0x20] sm:$0xff]   ;;  %v3196_v15 = vld [vmem:[%s3947_s3 + $0x48] sm:$0xff]  }
  0x16   : > { %2871 = vmatprep.subr.bf16.mxu1 %v3163_v18  ;;  %v3193_v10 = vld [vmem:[%s3947_s3 + $0x30] sm:$0xff]   ;;  %v3195_v13 = vld [vmem:[%s3947_s3 + $0x40] sm:$0xff]   ;;  %v3198_v18 = vld [vmem:[%s3947_s3 + $0x58] sm:$0xff]  }
  0x17   : > { %2850 = vmatpush3.bf16.msra.mxu0 %v3162_v17  ;;  %v3197_v16 = vld [vmem:[%s3947_s3 + $0x50] sm:$0xff]   ;;  %v3208_v32 = vld [vmem:[%s3949_s5 + $0x18] sm:$0xff]  }
  0x18   : > { %2851 = vmatprep.subr.bf16.mxu0 %v3165_v20 }
  0x19   : > { %2872 = vmatpush3.bf16.msra.mxu1 %v3164_v19  ;;  %v3199_v19 = vld [vmem:[%s3947_s3 + $0x60] sm:$0xff]  }
  0x1a   : > { %2873 = vmatprep.subr.bf16.mxu1 %v3167_v22  ;;  %v3201_v22 = vld [vmem:[%s3947_s3 + $0x70] sm:$0xff]  }
  0x1b   : > { %2852 = vmatpush3.bf16.msra.mxu0 %v3166_v21  ;;  %v3200_v21 = vld [vmem:[%s3947_s3 + $0x68] sm:$0xff]  }
  0x1c   : > { %2853 = vmatprep.subr.bf16.mxu0 %v3169_v24  ;;  %v3202_v24 = vld [vmem:[%s3947_s3 + $0x78] sm:$0xff]  }
  0x1d   : > { %2874 = vmatpush3.bf16.msra.mxu1 %v3168_v23 }
  0x1e   : > { %2875 = vmatprep.subr.bf16.mxu1 %v3171_v26 }
  0x1f   : > { %2854 = vmatpush3.bf16.msra.mxu0 %v3170_v25  ;;  %v3203_v25 = vld [vmem:[%s3947_s3 + $0x80] sm:$0xff]  }
  0x20   : > { %2855 = vmatprep.subr.bf16.mxu0 %v3173_v28 }
  0x21   : > { %2876 = vmatpush3.bf16.msra.mxu1 %v3172_v27  ;;  %v3204_v27 = vld [vmem:[%s3947_s3 + $0x88] sm:$0xff]  }
  0x22   : > { %2877 = vmatprep.subr.bf16.mxu1 %v3175_v30  ;;  %v3206_v30 = vld [vmem:[%s3949_s5 + $0x8] sm:$0xff]  }
  0x23   : > { %2856 = vmatpush3.bf16.msra.mxu0 %v3174_v29  ;;  %v3205_v29 = vld [vmem:[%s3949_s5] sm:$0xff]  }
  0x24   : > { %3009 = vmatprep.subr.bf16.mxu0 %v3281_v34 }
  0x25   : > { %2878 = vmatpush3.bf16.msra.mxu1 %v3179_v33  ;;  %v1473_v33 = vld [vmem:[%s3951_s7] sm:$0xff] }
  0x26   : > { %739 = vmatmul.mubr.bf16.vlgmr.msra.gmra.mrb[0].mxu0 %v3176_v31  ;;  %3027 = vmatprep.subr.bf16.mxu1 %v3281_v34  ;;  %v3207_v31 = vld [vmem:[%s3949_s5 + $0x10] sm:$0xff]  }
  0x27   : > { %3015 = vmatprep.mubr.msk.bf16.mxu0 %vm3282_vm0, %v3281_v34  ;;  %3010 = vmatpush3.bf16.msra.mxu0 %v3183_v37 }
  0x28   : > { %780 = vmatmul.mubr.bf16.vlgmr.msra.gmra.mrb[0].mxu1 %v3180_v35  ;;  %3011 = vmatprep.subr.bf16.mxu0 %v3281_v34  ;;  %v1477_v35 = vld [vmem:[%s3951_s7 + $0x20] sm:$0xff] }
  0x29   : > { %3031 = vmatprep.mubr.msk.bf16.mxu1 %vm3282_vm0, %v3281_v34  ;;  %3028 = vmatpush3.bf16.msra.mxu1 %v3188_v42  ;;  %v2739_v36 = vcombine.low %v1473_v33, %v1477_v35  ;;  %v2740_v37 = vcombine.high %v1473_v33, %v1477_v35  ;;  %v1488_v42 = vld [vmem:[%s3951_s7 + $0x78] sm:$0xff]  ;;  %v1494_v33 = vld [vmem:[%s3951_s7 + $0xa8] sm:$0xff] }
  0x2a   : > { %3029 = vmatprep.subr.bf16.mxu1 %v3281_v34  ;;  %v3221_v35 = vld [vmem:[%s3953_s9 + $0xc8] sm:$0xff]  }
  0x2b   : > { %3012 = vmatpush3.bf16.msra.mxu0 %v3184_v38  ;;  %v1476_v38 = vld [vmem:[%s3951_s7 + $0x18] sm:$0xff] }
  0x2c   : > { %3013 = vmatprep.subr.bf16.mxu0 %v3281_v34 }
  0x2d   : > { %3030 = vmatpush3.bf16.msra.mxu1 %v3190_v44 }
  0x2e   : > { %3035 = vmatprep.subr.bf16.mxu1 %v3281_v34 }
  0x2f   : > { %3014 = vmatpush3.bf16.msra.mxu0 %v3185_v39 }
  0x30   : > { %3019 = vmatprep.subr.bf16.mxu0 %v3281_v34 }
  0x32   : > { %3016 = vmatmul.mubr.msk.bf16.vlgmr.msra.gmra.mrb[4].mxu0 %vm702_vm1, %v3186_v40 }
  0x33   : > { %3023 = vmatprep.mubr.msk.bf16.mxu0 %vm3282_vm0, %v3281_v34  ;;  %3020 = vmatpush3.bf16.msra.mxu0 %v3187_v41  ;;  %v1484_v41 = vld [vmem:[%s3951_s7 + $0x58] sm:$0xff] }
  0x34   : > { %3021 = vmatprep.subr.bf16.mxu0 %v3281_v34  ;;  %v2754_v44 = vcombine.high %v1484_v41, %v1488_v42 }
  0x37   : > { %3022 = vmatpush3.bf16.msra.mxu0 %v3189_v43  ;;  %v2753_v43 = vcombine.low %v1484_v41, %v1488_v42 }
  0x38   : > { %3091 = vmatprep.subr.bf16.mxu0 %v3281_v34 }
  0xf9   : > { %v2857_v45 = vpop.f32.mrb[0].mxu0 }
  0xfa   : > { %v2858_v47 = vpop.f32.mrb[1].mxu0 }
  0xfb   : > { %v2859_v48 = vadd.f32 %v2858_v47, %v2857_v45  ;;  %v2860_v49 = vpop.f32.mrb[2].mxu0  ;;  %v2879_v50 = vpop.f32.mrb[0].mxu1  ;;  %v1492_v45 = vld [vmem:[%s3951_s7 + $0x98] sm:$0xff] }
  0xfc   : > { %v2861_v51 = vpop.f32.mrb[3].mxu0  ;;  %v2880_v52 = vpop.f32.mrb[1].mxu1 }
  0xfd   : > { %v741_v53 = vadd.f32 %v2859_v48, %v2633_v46  ;;  %v2862_v54 = vadd.f32 %v2861_v51, %v2860_v49  ;;  %v2881_v55 = vadd.f32 %v2880_v52, %v2879_v50  ;;  %v2882_v56 = vpop.f32.mrb[2].mxu1 }
  0xfe   : > { %v2883_v57 = vpop.f32.mrb[3].mxu1 }
  0xff   : > { %v744_v58 = vadd.f32 %v2862_v54, %v2633_v46  ;;  %v2884_v59 = vadd.f32 %v2883_v57, %v2882_v56  ;;  %v782_v60 = vadd.f32 %v2881_v55, %v741_v53  ;;  %v1496_v46 = vld [vmem:[%s3951_s7 + $0xb8] sm:$0xff]  ;;  %v832_v53 = vld [vmem:[%s3948_s4] sm:$0x1] }
 0x100   : > { %v2761_v47 = vcombine.low %v1492_v45, %v1496_v46  ;;  %v2762_v48 = vcombine.high %v1492_v45, %v1496_v46 }
 0x101   : > { %v785_v61 = vadd.f32 %v2884_v59, %v744_v58  ;;  %v1481_v59 = vld [vmem:[%s3951_s7 + $0x40] sm:$0xff] }
 0x105   : > { %v822_v62 = vpop.f32.mrb[4].mxu0 }
 0x106   : > { %v823_v63 = vadd.f32 %v822_v62, %v782_v60  ;;  %v3017_v0 = vpop.f32.mrb[5].mxu0  ;;  %v1485_v60 = vld [vmem:[%s3951_s7 + $0x60] sm:$0xff] }
 0x107   : > { %v825_v1 = vpop.f32.mrb[6].mxu0  ;;  %v2748_v0 = vcombine.high %v1481_v59, %v1485_v60 }
 0x108   : > { %v826_v2 = vadd.f32 %v825_v1, %v785_v61  ;;  %v3018_v3 = vpop.f32.mrb[7].mxu0  ;;  %v829_v4 = vmax.f32 %v823_v63, 0.0  ;;  %v1489_v1 = vld [vmem:[%s3951_s7 + $0x80] sm:$0xff] }
 0x109   : > { %v2747_v3 = vcombine.low %v1481_v59, %v1485_v60  ;;  %v3209_v60 = vld [vmem:[%s3953_s9 + $0x40] sm:$0xff]  }
 0x10a   : > { %v830_v5 = vmax.f32 %v826_v2, 0.0  ;;  %v1493_v2 = vld [vmem:[%s3951_s7 + $0xa0] sm:$0xff] }
 0x10c   : > { %v3504_v6 = vpack.c.bf16 %v830_v5, %v829_v4  ;;  %v2756_v4 = vcombine.high %v1489_v1, %v1493_v2  ;;  %v2755_v5 = vcombine.low %v1489_v1, %v1493_v2  ;;  %v3214_v1 = vld [vmem:[%s3953_s9 + $0x10] sm:$0xff]   ;;  %v3215_v2 = vld [vmem:[%s3953_s9 + $0x58] sm:$0xff]  }
 0x10e   : > { %3024 = vmatmul.mubr.msk.bf16.vlgmr.msra.gmra.mrb[8].mxu0 %vm849_vm2, %v3504_v6  ;;  %v899_v8 = vshrl.u32 %v3504_v6, 16  ;;  %v963_v11 = vrot.slane %v3504_v6, 1  ;;  %v1087_v17 = vrot.slane %v3504_v6, 2  ;;  %v1211_v23 = vrot.slane %v3504_v6, 3 }
 0x10f   : > { %3099 = vmatprep.mubr.msk.bf16.mxu0 %vm3282_vm0, %v3281_v34  ;;  %v1335_v28 = vrot.slane %v3504_v6, 4  ;;  %3092 = vmatpush3.bf16.msra.mxu0 %v3205_v29  ;;  %v1497_v6 = vld [vmem:[%s3951_s7 + $0xc0] sm:$0xff] }
 0x110   : > { %3032 = vmatmul.mubr.msk.bf16.vlgmr.msra.gmra.mrb[4].mxu1 %vm849_vm2, %v899_v8  ;;  %v1025_v14 = vrot.slane %v899_v8, 1  ;;  %v1149_v20 = vrot.slane %v899_v8, 2  ;;  %v1273_v26 = vrot.slane %v899_v8, 3  ;;  %3093 = vmatprep.subr.bf16.mxu0 %v3281_v34 }
 0x111   : > { %3036 = vmatpush3.bf16.msra.mxu1 %v3191_v7  ;;  %3039 = vmatprep.mubr.msk.bf16.mxu1 %vm3282_vm0, %v3281_v34  ;;  %v1501_v7 = vld [vmem:[%s3951_s7 + $0xe0] sm:$0xff] }
 0x112   : > { %3037 = vmatprep.subr.bf16.mxu1 %v3281_v34  ;;  %v2764_v8 = vcombine.high %v1497_v6, %v1501_v7 }
 0x113   : > { %3094 = vmatpush3.bf16.msra.mxu0 %v3206_v30 }
 0x114   : > { %3095 = vmatprep.subr.bf16.mxu0 %v3281_v34 }
 0x115   : > { %3038 = vmatpush3.bf16.msra.mxu1 %v3192_v9  ;;  %v1500_v9 = vld [vmem:[%s3951_s7 + $0xd8] sm:$0xff] }
 0x116   : > { %3043 = vmatprep.subr.bf16.mxu1 %v3281_v34 }
 0x117   : > { %3096 = vmatpush3.bf16.msra.mxu0 %v3207_v31  ;;  %v3219_v31 = vld [vmem:[%s3953_s9 + $0x80] sm:$0xff]  }
 0x118   : > { %3097 = vmatprep.subr.bf16.mxu0 %v3281_v34 }
 0x11b   : > { %3098 = vmatpush3.bf16.msra.mxu0 %v3208_v32  ;;  %v1490_v32 = vld [vmem:[%s3951_s7 + $0x88] sm:$0xff] }
 0x11c   : > { %3040 = vmatmul.mubr.msk.bf16.vlgmr.msra.gmra.mrb[4].mxu1 %vm849_vm2, %v963_v11  ;;  %1710 = vmatprep.subr.bf16.mxu0 %v2740_v37  ;;  %v2763_v11 = vcombine.low %v1497_v6, %v1501_v7  ;;  %v2758_v37 = vcombine.high %v1490_v32, %v1494_v33  ;;  %v2757_v41 = vcombine.low %v1490_v32, %v1494_v33  ;;  %v3222_v6 = vld [vmem:[%s3953_s9 + $0x68] sm:$0xff]  }
 0x11d   : > { %3044 = vmatpush3.bf16.msra.mxu1 %v3193_v10  ;;  %3047 = vmatprep.mubr.msk.bf16.mxu1 %vm3282_vm0, %v3281_v34  ;;  %v1504_v10 = vld [vmem:[%s3951_s7 + $0xf8] sm:$0xff]  ;;  %v3224_v7 = vld [vmem:[%s3953_s9 + $0x28] sm:$0xff]  }
 0x11e   : > { %3045 = vmatprep.subr.bf16.mxu1 %v3281_v34 }
 0x121   : > { %3046 = vmatpush3.bf16.msra.mxu1 %v3194_v12  ;;  %v2770_v12 = vcombine.high %v1500_v9, %v1504_v10 }
 0x122   : > { %3051 = vmatprep.subr.bf16.mxu1 %v3281_v34 }
 0x128   : > { %3048 = vmatmul.mubr.msk.bf16.vlgmr.msra.gmra.mrb[4].mxu1 %vm849_vm2, %v1025_v14  ;;  %v1474_v14 = vld [vmem:[%s3951_s7 + $0x8] sm:$0xff] }
 0x129   : > { %3052 = vmatpush3.bf16.msra.mxu1 %v3195_v13  ;;  %3055 = vmatprep.mubr.msk.bf16.mxu1 %vm3282_vm0, %v3281_v34  ;;  %v2769_v13 = vcombine.low %v1500_v9, %v1504_v10  ;;  %v3227_v9 = vld [vmem:[%s3953_s9 + $0x90] sm:$0xff]  }
 0x12a   : > { %3053 = vmatprep.subr.bf16.mxu1 %v3281_v34  ;;  %v3228_v10 = vld [vmem:[%s3953_s9 + $0x30] sm:$0xff]  }
 0x12d   : > { %3054 = vmatpush3.bf16.msra.mxu1 %v3196_v15  ;;  %v1478_v15 = vld [vmem:[%s3951_s7 + $0x28] sm:$0xff] }
 0x12e   : > { %3059 = vmatprep.subr.bf16.mxu1 %v3281_v34 }
 0x134   : > { %3056 = vmatmul.mubr.msk.bf16.vlgmr.msra.gmra.mrb[4].mxu1 %vm849_vm2, %v1087_v17  ;;  %v2742_v17 = vcombine.high %v1474_v14, %v1478_v15 }
 0x135   : > { %3060 = vmatpush3.bf16.msra.mxu1 %v3197_v16  ;;  %3063 = vmatprep.mubr.msk.bf16.mxu1 %vm3282_vm0, %v3281_v34  ;;  %v2741_v16 = vcombine.low %v1474_v14, %v1478_v15  ;;  %v3232_v14 = vld [vmem:[%s3953_s9 + $0x38] sm:$0xff]   ;;  %v3233_v15 = vld [vmem:[%s3953_s9 + $0xe0] sm:$0xff]  }
 0x136   : > { %3061 = vmatprep.subr.bf16.mxu1 %v3281_v34 }
 0x139   : > { %3062 = vmatpush3.bf16.msra.mxu1 %v3198_v18  ;;  %v3283_v18 = vmov 0  }
 0x13a   : > { %3067 = vmatprep.subr.bf16.mxu1 %v3281_v34 }
 0x140   : > { %3064 = vmatmul.mubr.msk.bf16.vlgmr.msra.gmra.mrb[4].mxu1 %vm849_vm2, %v1149_v20  ;;  %v1402_v20 = vld [vmem:[%s3950_s6] sm:$0x1] }
 0x141   : > { %3068 = vmatpush3.bf16.msra.mxu1 %v3199_v19  ;;  %3071 = vmatprep.mubr.msk.bf16.mxu1 %vm3282_vm0, %v3281_v34  ;;  %v3217_v19 = vld [vmem:[%s3953_s9 + $0xc0] sm:$0xff]  }
 0x142   : > { %3069 = vmatprep.subr.bf16.mxu1 %v3281_v34 }
 0x145   : > { %3070 = vmatpush3.bf16.msra.mxu1 %v3200_v21 }
 0x146   : > { %3075 = vmatprep.subr.bf16.mxu1 %v3281_v34 }
 0x14c   : > { %3072 = vmatmul.mubr.msk.bf16.vlgmr.msra.gmra.mrb[4].mxu1 %vm849_vm2, %v1211_v23 }
 0x14d   : > { %3076 = vmatpush3.bf16.msra.mxu1 %v3201_v22  ;;  %3079 = vmatprep.mubr.msk.bf16.mxu1 %vm3282_vm0, %v3281_v34 }
 0x14e   : > { %3077 = vmatprep.subr.bf16.mxu1 %v3281_v34 }
 0x151   : > { %3078 = vmatpush3.bf16.msra.mxu1 %v3202_v24 }
 0x152   : > { %3083 = vmatprep.subr.bf16.mxu1 %v3281_v34 }
 0x158   : > { %3080 = vmatmul.mubr.msk.bf16.vlgmr.msra.gmra.mrb[4].mxu1 %vm849_vm2, %v1273_v26  ;;  %v1486_v26 = vld [vmem:[%s3951_s7 + $0x68] sm:$0xff] }
 0x159   : > { %3084 = vmatpush3.bf16.msra.mxu1 %v3203_v25  ;;  %3087 = vmatprep.mubr.msk.bf16.mxu1 %vm3282_vm0, %v3281_v34  ;;  %v1482_v25 = vld [vmem:[%s3951_s7 + $0x48] sm:$0xff] }
 0x15a   : > { %3085 = vmatprep.subr.bf16.mxu1 %v3281_v34  ;;  %v1480_v34 = vld [vmem:[%s3951_s7 + $0x38] sm:$0xff]  ;;  %v2750_v30 = vcombine.high %v1482_v25, %v1486_v26 }
 0x15b   : > { %v2745_v39 = vcombine.low %v1476_v38, %v1480_v34  ;;  %v2746_v40 = vcombine.high %v1476_v38, %v1480_v34  ;;  %v3223_v38 = vld [vmem:[%s3953_s9 + $0x88] sm:$0xff]  }
 0x15c   : > { %v1498_v34 = vld [vmem:[%s3951_s7 + $0xc8] sm:$0xff] }
 0x15d   : > { %3086 = vmatpush3.bf16.msra.mxu1 %v3204_v27 }
 0x15e   : > { %1833 = vmatprep.subr.bf16.mxu1 %v2746_v40  ;;  %v3225_v40 = vld [vmem:[%s3953_s9 + $0xd0] sm:$0xff]  }
 0x164   : > { %3088 = vmatmul.mubr.msk.bf16.vlgmr.msra.gmra.mrb[4].mxu1 %vm849_vm2, %v1335_v28 }
 0x165   : > { %1834 = vmatpush1.bf16.msra.mxu1 %v2745_v39  ;;  %1865 = vmatprep.mubr.bf16.mxu1 %v3283_v18  ;;  %v1502_v39 = vld [vmem:[%s3951_s7 + $0xe8] sm:$0xff] }
 0x166   : > { %1835 = vmatprep.subr.bf16.mxu1 %v2754_v44  ;;  %v2766_v42 = vcombine.high %v1498_v34, %v1502_v39  ;;  %v1479_v44 = vld [vmem:[%s3951_s7 + $0x30] sm:$0xff]  ;;  %v2765_v45 = vcombine.low %v1498_v34, %v1502_v39 }
 0x169   : > { %1836 = vmatpush1.bf16.msra.mxu1 %v2753_v43  ;;  %v1475_v43 = vld [vmem:[%s3951_s7 + $0x10] sm:$0xff] }
 0x16a   : > { %1837 = vmatprep.subr.bf16.mxu1 %v2762_v48  ;;  %v2744_v46 = vcombine.high %v1475_v43, %v1479_v44  ;;  %v1487_v48 = vld [vmem:[%s3951_s7 + $0x70] sm:$0xff] }
 0x16d   : > { %1838 = vmatpush1.bf16.msra.mxu1 %v2761_v47  ;;  %v1483_v47 = vld [vmem:[%s3951_s7 + $0x50] sm:$0xff] }
 0x16e   : > { %1839 = vmatprep.subr.bf16.mxu1 %v2770_v12  ;;  %v3230_v12 = vld [vmem:[%s3953_s9 + $0x78] sm:$0xff]  }
 0x171   : > { %1840 = vmatpush1.bf16.msra.mxu1 %v2769_v13  ;;  %v3231_v13 = vld [vmem:[%s3953_s9 + $0x98] sm:$0xff]  }
 0x172   : > { %2943 = vmatprep.subr.bf16.mxu1 %v3217_v19  ;;  %v3238_v19 = vld [vmem:[%s3953_s9 + $0xa8] sm:$0xff]  }
 0x1e1   : > { %v887_v49 = vpop.f32.mrb[8].mxu0 }
 0x1e2   : > { %v3025_v50 = vpop.f32.mrb[9].mxu0  ;;  %v893_v54 = vadd.f32 %v887_v49, %v832_v53  ;;  %v2743_v49 = vcombine.low %v1475_v43, %v1479_v44  ;;  %v2751_v53 = vcombine.low %v1483_v47, %v1487_v48 }
 0x1e3   : > { %v890_v51 = vpop.f32.mrb[10].mxu0  ;;  %v2752_v50 = vcombine.high %v1483_v47, %v1487_v48  ;;  %v3239_v47 = vld [vmem:[%s3953_s9 + $0x148] sm:$0xff]  }
 0x1e4   : > { %v3026_v52 = vpop.f32.mrb[11].mxu0  ;;  %v1491_v51 = vld [vmem:[%s3951_s7 + $0x90] sm:$0xff] }
 0x1e5   : > { %v1495_v52 = vld [vmem:[%s3951_s7 + $0xb0] sm:$0xff] }
 0x237   : > { %v1385_v55 = vpop.f32.mrb[4].mxu1 }
 0x238   : > { %v3104_v56 = vadd.f32 %v1385_v55, %v893_v54  ;;  %v3089_v57 = vpop.f32.mrb[5].mxu1  ;;  %v2760_v54 = vcombine.high %v1491_v51, %v1495_v52  ;;  %v1499_v55 = vld [vmem:[%s3951_s7 + $0xd0] sm:$0xff] }
 0x239   : > { %v1388_v58 = vpop.f32.mrb[6].mxu1  ;;  %v2759_v57 = vcombine.low %v1491_v51, %v1495_v52  ;;  %v3243_v52 = vld [vmem:[%s3953_s9 + $0x150] sm:$0xff]  }
 0x23a   : > { %v1392_v61 = vmax.f32 %v3104_v56, 0.0  ;;  %v3090_v62 = vpop.f32.mrb[7].mxu1  ;;  %v1503_v56 = vld [vmem:[%s3951_s7 + $0xf0] sm:$0xff] }
 0x23b   : > { %v2768_v58 = vcombine.high %v1499_v55, %v1503_v56  ;;  %v2767_v59 = vcombine.low %v1499_v55, %v1503_v56  ;;  %v3211_v62 = vld [vmem:[%s3953_s9 + $0x48] sm:$0xff]   ;;  %v3244_v56 = vld [vmem:[%s3953_s9 + $0x110] sm:$0xff]  }
 0x23c   : > { %v1393_v63 = vpack.c.bf16 %v1392_v61, %v1392_v61  ;;  %v3210_v61 = vld [vmem:[%s3953_s9] sm:$0xff]  }
 0x23e   : > { %3100 = vmatmul.mubr.msk.bf16.vlgmr.msra.gmra.mrb[12].mxu0 %vm1427_vm3, %v1393_v63  ;;  %v3212_v63 = vld [vmem:[%s3953_s9 + $0x8] sm:$0xff]  }
 0x23f   : > { %1711 = vmatpush1.bf16.msra.mxu0 %v2739_v36  ;;  %1742 = vmatprep.mubr.bf16.mxu0 %v3283_v18  ;;  %v2749_v36 = vcombine.low %v1482_v25, %v1486_v26  ;;  %v1667_v25 = vlaneseq }
 0x240   : > { %1712 = vmatprep.subr.bf16.mxu0 %v2748_v0  ;;  %v3213_v0 = vld [vmem:[%s3953_s9 + $0x50] sm:$0xff]  }
 0x241   : > { %v3817_v26 = vshrl.u32 %v1667_v25, 7 }
 0x243   : > { %1713 = vmatpush1.bf16.msra.mxu0 %v2747_v3  ;;  %v3216_v3 = vld [vmem:[%s3953_s9 + $0x18] sm:$0xff]   ;;  %v1697_v48 = vsub.s32 7, %v3817_v26  ;;  %v1681_v51 = vsub.s32 3, %v3817_v26 }
 0x244   : > { %1714 = vmatprep.subr.bf16.mxu0 %v2756_v4  ;;  %v3218_v4 = vld [vmem:[%s3953_s9 + $0x60] sm:$0xff]  }
 0x247   : > { %1715 = vmatpush1.bf16.msra.mxu0 %v2755_v5  ;;  %v3220_v5 = vld [vmem:[%s3953_s9 + $0x20] sm:$0xff]  }
 0x248   : > { %1716 = vmatprep.subr.bf16.mxu0 %v2764_v8  ;;  %v3226_v8 = vld [vmem:[%s3953_s9 + $0x70] sm:$0xff]  }
 0x24b   : > { %1717 = vmatpush1.bf16.msra.mxu0 %v2763_v11  ;;  %v3229_v11 = vld [vmem:[%s3953_s9 + $0xd8] sm:$0xff]  }
 0x24c   : > { %1751 = vmatprep.subr.bf16.mxu0 %v2742_v17  ;;  %v3235_v17 = vld [vmem:[%s3953_s9 + $0x140] sm:$0xff]  }
 0x311   : > { %v1465_v21 = vpop.f32.mrb[12].mxu0 }
 0x312   : > { %v1466_v22 = vadd.f32 %v1465_v21, %v1402_v20  ;;  %v3101_v23 = vpop.f32.mrb[13].mxu0  ;;  %v3241_v20 = vld [vmem:[%s3953_s9 + $0xf0] sm:$0xff]  }
 0x313   : > { %v1468_v24 = vpop.f32.mrb[14].mxu0  ;;  %v3242_v21 = vld [vmem:[%s3953_s9 + $0xb0] sm:$0xff]   ;;  %v3246_v23 = vld [vmem:[%s3953_s9 + $0xb8] sm:$0xff]  }
 0x314   : > { %v1471_v27 = vmax.f32 %v1466_v22, 0.0  ;;  %v3102_v28 = vpop.f32.mrb[15].mxu0  ;;  %v3245_v22 = vld [vmem:[%s3953_s9 + $0xf8] sm:$0xff]   ;;  %v3249_v24 = vld [vmem:[%s3953_s9 + $0x1c0] sm:$0xff]  }
 0x315   : > { %v3823_v28 = vld [vmem:[%s3952_s8] sm:$0xff] }
 0x316   : > { %v1472_v29 = vpack.c.bf16 %v1471_v27, %v1471_v27  ;;  %v1669_v27 = vsub.s32 0, %v3817_v26  ;;  %v1682_v55 = vrot.slane %v3823_v28, %v1681_v51 }
 0x318   : > { %2771 = vmatmul.mubr.msk.bf16.vlgmr.msra.gmra.mrb[16].mxu0 %vm1427_vm3, %v1472_v29  ;;  %2774 = vmatmul.mubr.msk.bf16.vlgmr.msra.gmra.mrb[8].mxu1 %vm1427_vm3, %v1472_v29 }
 0x319   : > { %1752 = vmatpush1.bf16.msra.mxu0 %v2741_v16  ;;  %1783 = vmatprep.mubr.bf16.mxu0 %v3283_v18  ;;  %v3234_v16 = vld [vmem:[%s3953_s9 + $0xa0] sm:$0xff]  }
 0x31a   : > { %1753 = vmatprep.subr.bf16.mxu0 %v2750_v30  ;;  %2944 = vmatpush3.bf16.msra.mxu1 %v3219_v31  ;;  %v1670_v30 = vrot.slane %v3823_v28, %v1669_v27 }
 0x31b   : > { %2945 = vmatprep.subr.bf16.mxu1 %v3221_v35 }
 0x31d   : > { %1754 = vmatpush1.bf16.msra.mxu0 %v2749_v36 }
 0x31e   : > { %1755 = vmatprep.subr.bf16.mxu0 %v2758_v37  ;;  %2946 = vmatpush3.bf16.msra.mxu1 %v3223_v38 }
 0x31f   : > { %2947 = vmatprep.subr.bf16.mxu1 %v3225_v40 }
 0x321   : > { %1756 = vmatpush1.bf16.msra.mxu0 %v2757_v41 }
 0x322   : > { %1757 = vmatprep.subr.bf16.mxu0 %v2766_v42  ;;  %2948 = vmatpush3.bf16.msra.mxu1 %v3227_v9 }
 0x323   : > { %2949 = vmatprep.subr.bf16.mxu1 %v3229_v11  ;;  %v3254_v11 = vld [vmem:[%s3953_s9 + $0x168] sm:$0xff]  }
 0x325   : > { %1758 = vmatpush1.bf16.msra.mxu0 %v2765_v45  ;;  %v3236_v45 = vld [vmem:[%s3953_s9 + $0x100] sm:$0xff]  }
 0x326   : > { %1792 = vmatprep.subr.bf16.mxu0 %v2744_v46  ;;  %2950 = vmatpush3.bf16.msra.mxu1 %v3231_v13  ;;  %v1685_v13 = vsub.s32 4, %v3817_v26 }
 0x327   : > { %2951 = vmatprep.subr.bf16.mxu1 %v3233_v15  ;;  %v3256_v15 = vld [vmem:[%s3953_s9 + $0x128] sm:$0xff]  }
 0x328   : > { %2772 = vmatmul.mubr.msk.bf16.vlgmr.msra.gmra.mrb[20].mxu0 %vm1427_vm3, %v1472_v29 }
 0x329   : > { %1793 = vmatpush1.bf16.msra.mxu0 %v2743_v49  ;;  %1824 = vmatprep.mubr.bf16.mxu0 %v3283_v18  ;;  %v3237_v18 = vld [vmem:[%s3953_s9 + $0xe8] sm:$0xff]   ;;  %v1677_v49 = vsub.s32 2, %v3817_v26 }
 0x32a   : > { %1794 = vmatprep.subr.bf16.mxu0 %v2752_v50  ;;  %2952 = vmatpush3.bf16.msra.mxu1 %v3234_v16  ;;  %v3240_v50 = vld [vmem:[%s3953_s9 + $0x108] sm:$0xff]   ;;  %v1689_v16 = vsub.s32 5, %v3817_v26 }
 0x32b   : > { %2953 = vmatprep.subr.bf16.mxu1 %v3237_v18  ;;  %v3258_v18 = vld [vmem:[%s3953_s9 + $0x170] sm:$0xff]  }
 0x32d   : > { %1795 = vmatpush1.bf16.msra.mxu0 %v2751_v53  ;;  %v1698_v53 = vrot.slane %v3823_v28, %v1697_v48 }
 0x32e   : > { %1796 = vmatprep.subr.bf16.mxu0 %v2760_v54  ;;  %2954 = vmatpush3.bf16.msra.mxu1 %v3238_v19  ;;  %v1678_v54 = vrot.slane %v3823_v28, %v1677_v49  ;;  %v1686_v19 = vrot.slane %v3823_v28, %v1685_v13  ;;  %v3271_v49 = vld [vmem:[%s3953_s9 + $0x1f8] sm:$0xff]  }
 0x32f   : > { %2955 = vmatprep.subr.bf16.mxu1 %v3241_v20  ;;  %v1690_v20 = vrot.slane %v3823_v28, %v1689_v16 }
 0x331   : > { %1797 = vmatpush1.bf16.msra.mxu0 %v2759_v57  ;;  %v3247_v57 = vld [vmem:[%s3953_s9 + $0x158] sm:$0xff]  }
 0x332   : > { %1798 = vmatprep.subr.bf16.mxu0 %v2768_v58  ;;  %2956 = vmatpush3.bf16.msra.mxu1 %v3242_v21  ;;  %v3259_v21 = vld [vmem:[%s3953_s9 + $0x190] sm:$0xff]  }
 0x333   : > { %2957 = vmatprep.subr.bf16.mxu1 %v3245_v22  ;;  %v3260_v22 = vld [vmem:[%s3953_s9 + $0x130] sm:$0xff]  }
 0x335   : > { %1799 = vmatpush1.bf16.msra.mxu0 %v2767_v59 }
 0x336   : > { %2921 = vmatprep.subr.bf16.mxu0 %v3209_v60  ;;  %2958 = vmatpush3.bf16.msra.mxu1 %v3246_v23  ;;  %v3261_v23 = vld [vmem:[%s3953_s9 + $0x1d8] sm:$0xff]  }
 0x337   : > { %2987 = vmatprep.subr.bf16.mxu1 %v3249_v24  ;;  %v3262_v24 = vld [vmem:[%s3953_s9 + $0x178] sm:$0xff]  }
 0x338   : > { %2773 = vmatmul.mubr.msk.bf16.vlgmr.msra.gmra.mrb[24].mxu0 %vm1427_vm3, %v1472_v29  ;;  %v1673_v29 = vsub.s32 1, %v3817_v26 }
 0x339   : > { %2922 = vmatpush3.bf16.msra.mxu0 %v3210_v61 }
 0x33a   : > { %2923 = vmatprep.subr.bf16.mxu0 %v3211_v62  ;;  %v1674_v31 = vrot.slane %v3823_v28, %v1673_v29 }
 0x33d   : > { %2924 = vmatpush3.bf16.msra.mxu0 %v3212_v63 }
 0x33e   : > { %2925 = vmatprep.subr.bf16.mxu0 %v3213_v0  ;;  %v3248_v0 = vld [vmem:[%s3953_s9 + $0x118] sm:$0xff]  }
 0x341   : > { %2926 = vmatpush3.bf16.msra.mxu0 %v3214_v1 }
 0x342   : > { %2927 = vmatprep.subr.bf16.mxu0 %v3215_v2 }
 0x345   : > { %2928 = vmatpush3.bf16.msra.mxu0 %v3216_v3  ;;  %v3250_v3 = vld [vmem:[%s3953_s9 + $0x160] sm:$0xff]  }
 0x346   : > { %2929 = vmatprep.subr.bf16.mxu0 %v3218_v4 }
 0x349   : > { %2930 = vmatpush3.bf16.msra.mxu0 %v3220_v5 }
 0x34a   : > { %2931 = vmatprep.subr.bf16.mxu0 %v3222_v6 }
 0x34d   : > { %2932 = vmatpush3.bf16.msra.mxu0 %v3224_v7  ;;  %v3251_v7 = vld [vmem:[%s3953_s9 + $0x180] sm:$0xff]  }
 0x34e   : > { %2933 = vmatprep.subr.bf16.mxu0 %v3226_v8  ;;  %v3252_v8 = vld [vmem:[%s3953_s9 + $0x120] sm:$0xff]  }
 0x351   : > { %2934 = vmatpush3.bf16.msra.mxu0 %v3228_v10  ;;  %v3253_v10 = vld [vmem:[%s3953_s9 + $0x1c8] sm:$0xff]  }
 0x352   : > { %2935 = vmatprep.subr.bf16.mxu0 %v3230_v12 }
 0x355   : > { %2936 = vmatpush3.bf16.msra.mxu0 %v3232_v14  ;;  %v3255_v14 = vld [vmem:[%s3953_s9 + $0x188] sm:$0xff]  }
 0x356   : > { %2965 = vmatprep.subr.bf16.mxu0 %v3235_v17  ;;  %v3257_v17 = vld [vmem:[%s3953_s9 + $0x1d0] sm:$0xff]  }
 0x3eb   : > { %v1744_v32 = vpop.f32.mrb[16].mxu0  ;;  %v3828_v33 = vpop.f32.mrb[8].mxu1 }
 0x3ec   : > { %v1745_v35 = vadd.f32 %v1744_v32, %v1670_v30  ;;  %v1746_v36 = vpop.f32.mrb[17].mxu0  ;;  %v1869_v37 = vpop.f32.mrb[9].mxu1 }
 0x3ed   : > { %v1747_v38 = vadd.f32 %v1746_v36, %v1674_v31  ;;  %v1748_v34 = vpop.f32.mrb[18].mxu0  ;;  %v1871_v39 = vpop.f32.mrb[10].mxu1  ;;  %v1870_v59 = vadd.f32 %v1869_v37, %v1698_v53  ;;  %v3264_v36 = vld [vmem:[%s3953_s9 + $0x138] sm:$0xff]  }
 0x3ee   : > { %v1874_v40 = vmax.f32 %v1745_v35, 0.0  ;;  %v1749_v41 = vpop.f32.mrb[19].mxu0  ;;  %v1872_v42 = vpop.f32.mrb[11].mxu1  ;;  %v3263_v35 = vld [vmem:[%s3953_s9 + $0x198] sm:$0xff]   ;;  %v3265_v34 = vld [vmem:[%s3953_s9 + $0x1e0] sm:$0xff]  }
 0x3ef   : > { %v1875_v43 = vmax.f32 %v1747_v38, 0.0  ;;  %v1881_v5 = vmax.f32 %v1870_v59, 0.0  ;;  %v3266_v41 = vld [vmem:[%s3953_s9 + $0x1a0] sm:$0xff]   ;;  %v1693_v42 = vsub.s32 6, %v3817_v26  ;;  %v3269_v26 = vld [vmem:[%s3953_s9 + $0x1f0] sm:$0xff]  }
 0x3f0   : > { %v1882_v46 = vpack.c.bf16 %v1874_v40, %v1874_v40 }
 0x3f1   : > { %v1883_v44 = vpack.c.bf16 %v1875_v43, %v1875_v43  ;;  %v1889_v12 = vpack.c.bf16 %v1881_v5, %v1881_v5 }
 0x3f3   : > { %2435 = vmatprep.mubr.bf16.mxu0 %v1883_v44  ;;  %v3267_v44 = vld [vmem:[%s3953_s9 + $0x1e8] sm:$0xff]  }
 0x3f4   : > { %2436 = vmatmul.mubr.bf16.vlgmr.msra.gmra.mrb[28].mxu0 %v1882_v46  ;;  %v1694_v46 = vrot.slane %v3823_v28, %v1693_v42  ;;  %v3272_v28 = vld [vmem:[%s3953_s9 + $0x1b8] sm:$0xff]  }
 0x3f5   : > { %2966 = vmatpush3.bf16.msra.mxu0 %v3236_v45  ;;  %v3268_v45 = vld [vmem:[%s3953_s9 + $0x1a8] sm:$0xff]  }
 0x3f6   : > { %2967 = vmatprep.subr.bf16.mxu0 %v3239_v47  ;;  %v3270_v47 = vld [vmem:[%s3953_s9 + $0x1b0] sm:$0xff]   ;;  %v1868_v48 = vadd.f32 %v3828_v33, %v1694_v46 }
 0x3f9   : > { %2968 = vmatpush3.bf16.msra.mxu0 %v3240_v50  ;;  %v1880_v50 = vmax.f32 %v1868_v48, 0.0 }
 0x3fa   : > { %2969 = vmatprep.subr.bf16.mxu0 %v3243_v52 }
 0x3fb   : > { %v1785_v58 = vpop.f32.mrb[20].mxu0  ;;  %v1888_v51 = vpack.c.bf16 %v1880_v50, %v1880_v50 }
 0x3fc   : > { %v1786_v60 = vadd.f32 %v1785_v58, %v1678_v54  ;;  %v1787_v61 = vpop.f32.mrb[21].mxu0 }
 0x3fd   : > { %v1788_v62 = vadd.f32 %v1787_v61, %v1682_v55  ;;  %v1789_v63 = vpop.f32.mrb[22].mxu0  ;;  %2970 = vmatpush3.bf16.msra.mxu0 %v3244_v56  ;;  %v2018_v56 = vld [vmem:[%s3954_s10] sm:$0x1] }
 0x3fe   : > { %v1876_v1 = vmax.f32 %v1786_v60, 0.0  ;;  %v1790_v2 = vpop.f32.mrb[23].mxu0  ;;  %2971 = vmatprep.subr.bf16.mxu0 %v3247_v57 }
 0x3ff   : > { %v1877_v4 = vmax.f32 %v1788_v62, 0.0 }
 0x400   : > { %v1884_v9 = vpack.c.bf16 %v1876_v1, %v1876_v1 }
 0x401   : > { %v1885_v6 = vpack.c.bf16 %v1877_v4, %v1877_v4  ;;  %2972 = vmatpush3.bf16.msra.mxu0 %v3248_v0 }
 0x402   : > { %2973 = vmatprep.subr.bf16.mxu0 %v3250_v3 }
 0x403   : > { %2475 = vmatprep.mubr.bf16.mxu1 %v1885_v6 }
 0x404   : > { %2476 = vmatmul.mubr.bf16.vlgmr.msra.gmra.mrb[12].mxu1 %v1884_v9 }
 0x405   : > { %2988 = vmatpush3.bf16.msra.mxu1 %v3251_v7  ;;  %2974 = vmatpush3.bf16.msra.mxu0 %v3252_v8  ;;  %v2565_v8 = vand.u32 127, %v1667_v25 }
 0x406   : > { %2555 = vmatprep.mubr.bf16.mxu1 %v1889_v12  ;;  %2989 = vmatprep.subr.bf16.mxu1 %v3253_v10 }
 0x407   : > { %2975 = vmatprep.subr.bf16.mxu0 %v3254_v11  ;;  %vm2566_vm4 = vcmp.eq.s32.totalorder %v2565_v8, 127 }
 0x409   : > { %2990 = vmatpush3.bf16.msra.mxu1 %v3255_v14  ;;  %2976 = vmatpush3.bf16.msra.mxu0 %v3256_v15 }
 0x40a   : > { %2991 = vmatprep.subr.bf16.mxu1 %v3257_v17  ;;  %2977 = vmatprep.subr.bf16.mxu0 %v3258_v18 }
 0x40b   : > { %v1826_v27 = vpop.f32.mrb[24].mxu0 }
 0x40c   : > { %v1827_v29 = vadd.f32 %v1826_v27, %v1686_v19  ;;  %v1828_v30 = vpop.f32.mrb[25].mxu0 }
 0x40d   : > { %v1829_v31 = vadd.f32 %v1828_v30, %v1690_v20  ;;  %2992 = vmatpush3.bf16.msra.mxu1 %v3259_v21  ;;  %v1830_v32 = vpop.f32.mrb[26].mxu0  ;;  %2978 = vmatpush3.bf16.msra.mxu0 %v3260_v22 }
 0x40e   : > { %v1878_v37 = vmax.f32 %v1827_v29, 0.0  ;;  %v1831_v38 = vpop.f32.mrb[27].mxu0  ;;  %2993 = vmatprep.subr.bf16.mxu1 %v3261_v23  ;;  %2979 = vmatprep.subr.bf16.mxu0 %v3262_v24 }
 0x40f   : > { %v1879_v39 = vmax.f32 %v1829_v31, 0.0 }
 0x410   : > { %v1886_v43 = vpack.c.bf16 %v1878_v37, %v1878_v37 }
 0x411   : > { %v1887_v40 = vpack.c.bf16 %v1879_v39, %v1879_v39  ;;  %2994 = vmatpush3.bf16.msra.mxu1 %v3263_v35  ;;  %2980 = vmatpush3.bf16.msra.mxu0 %v3264_v36 }
 0x412   : > { %2995 = vmatprep.subr.bf16.mxu1 %v3265_v34 }
 0x413   : > { %2515 = vmatprep.mubr.bf16.mxu0 %v1887_v40 }
 0x414   : > { %2516 = vmatmul.mubr.bf16.vlgmr.msra.gmra.mrb[32].mxu0 %v1886_v43 }
 0x415   : > { %2996 = vmatpush3.bf16.msra.mxu1 %v3266_v41 }
 0x416   : > { %2997 = vmatprep.subr.bf16.mxu1 %v3267_v44 }
 0x419   : > { %2998 = vmatpush3.bf16.msra.mxu1 %v3268_v45 }
 0x41a   : > { %2999 = vmatprep.subr.bf16.mxu1 %v3269_v26 }
 0x41d   : > { %3000 = vmatpush3.bf16.msra.mxu1 %v3270_v47 }
 0x41e   : > { %3001 = vmatprep.subr.bf16.mxu1 %v3271_v49 }
 0x421   : > { %3002 = vmatpush3.bf16.msra.mxu1 %v3272_v28 }
 0x424   : > { %2556 = vmatmul.mubr.bf16.vlgmr.msra.gmra.mrb[16].mxu1 %v1888_v51 }
 0x4c7   : > { %v2937_v52 = vpop.f32.mrb[28].mxu0 }
 0x4c8   : > { %v2938_v53 = vpop.f32.mrb[29].mxu0 }
 0x4c9   : > { %v2939_v54 = vadd.f32 %v2938_v53, %v2937_v52  ;;  %v2940_v55 = vpop.f32.mrb[30].mxu0 }
 0x4ca   : > { %v2941_v33 = vpop.f32.mrb[31].mxu0 }
 0x4cb   : > { %v2438_v59 = vadd.f32 %v2939_v54, %v2018_v56 }
 0x4d7   : > { %v2959_v57 = vpop.f32.mrb[12].mxu1 }
 0x4d8   : > { %v2960_v58 = vpop.f32.mrb[13].mxu1 }
 0x4d9   : > { %v2961_v60 = vadd.f32 %v2960_v58, %v2959_v57  ;;  %v2962_v61 = vpop.f32.mrb[14].mxu1 }
 0x4da   : > { %v2963_v62 = vpop.f32.mrb[15].mxu1 }
 0x4db   : > { %v2478_v63 = vadd.f32 %v2961_v60, %v2438_v59 }
 0x4e7   : > { %v2981_v0 = vpop.f32.mrb[32].mxu0 }
 0x4e8   : > { %v2982_v1 = vpop.f32.mrb[33].mxu0 }
 0x4e9   : > { %v2983_v2 = vadd.f32 %v2982_v1, %v2981_v0  ;;  %v2984_v3 = vpop.f32.mrb[34].mxu0 }
 0x4ea   : > { %v2985_v4 = vpop.f32.mrb[35].mxu0 }
 0x4eb   : > { %v2518_v5 = vadd.f32 %v2983_v2, %v2478_v63 }
 0x4f7   : > { %v3003_v6 = vpop.f32.mrb[16].mxu1 }
 0x4f8   : > { %v3004_v7 = vpop.f32.mrb[17].mxu1 }
 0x4f9   : > { %v3005_v9 = vadd.f32 %v3004_v7, %v3003_v6  ;;  %v3006_v10 = vpop.f32.mrb[18].mxu1 }
 0x4fa   : > { %v3007_v11 = vpop.f32.mrb[19].mxu1 }
 0x4fb   : > { %v2558_v12 = vadd.f32 %v3005_v9, %v2518_v5 }
 0x4fd   : > { %v2563_v13 = vmax.f32 %v2558_v12, 0.0 }
 0x4ff   : > { %v2567_v14 = vsel %vm2566_vm4, %v2563_v13, 0.0  ;;  %v2572_v16 = vsel %vm2568_vm5, %v2563_v13, 0.0 }
 0x500   : > { %v2569_v15 = vsel %vm2568_vm5, %v2567_v14, 0.0 }
 0x501   : > { %2570 = vadd.xlane.f32.xlu0 %v2569_v15 }
 0x505   : > { %2573 = vadd.xlane.f32.xlu0 %v2572_v16 }
 0x58e   : > { %v2571_v17 = vpop.xlane.xlu0 %2570 }
 0x58f   : > { %v2576_v20 = vadd.f32 %v2571_v17, %v2563_v13 }
 0x592   : > { %v2574_v18 = vpop.xlane.xlu0 %2573 }
 0x593   : > { %v2575_v19 = vsub.f32 %v2574_v18, %v2571_v17 }
 0x595   : > { %v2577_v21 = vmul.f32 0.16666667, %v2575_v19 }
 0x597   : > { %v2578_v25 = vsub.f32 %v2576_v20, %v2577_v21 }
 0x599   : > { %2579 = vst [vmem:[%s382_s16] sm:$0x1] %v2578_v25 }
 0x59a PF: > { %s21_s17 = sadd.s32 1, %s3279_s17  }
 0x59b   : > { %p18_p4 = scmp.ge.s32.totalorder %s21_s17, 4  }
 0x59d   :  { %20 = sbr.rel (!%p18_p4) target bundleno = 1 (0x1), region = 102 }

</bundles_post_ra>
